<compile_context>
chip_gen: v7x
topology: tpu7x:2x2x1
jax: 0.10.0
libtpu: 0.0.40
codegen_flags: <defaults>
</compile_context>

<pallas_src>
import functools

import jax
import jax.numpy as jnp
from jax import lax
from jax.experimental import pallas as pl
from jax.experimental.pallas import tpu as pltpu


def temporal_attention_kernel(xa_ref, w1_ref, w3_ref, be_ref, ve_ref, out_ref):
    # xa_ref : (1, Bt*T, C*V)  VMEM   xa[(b,t), (c,v)] = x[b, v, c, t]
    # w1_ref : (C*V, V)        VMEM   W1[(c,v), w] = U1[v] * U2[c, w]
    # w3_ref : (C*V, V)        VMEM   W3[(c,v), w] = U3[c] * (v == w)
    # be_ref : (T, T)          VMEM   b_e[0]
    # ve_ref : (T, T)          VMEM   V_e
    # out_ref: (1, T, Bt*T)    VMEM   out[t1, b*T + t2] = E_norm[b, t1, t2]
    T = ve_ref.shape[0]
    bt = xa_ref.shape[1] // T

    xa = xa_ref[0]                                                      # (Bt*T, C*V)
    # Stacked MXU contractions over (c, v) for all Bt*T rows at once.
    lhs = jnp.dot(xa, w1_ref[...], preferred_element_type=jnp.float32)   # (Bt*T, V) : lhs[(b,t), w]
    rhsT = jnp.dot(xa, w3_ref[...], preferred_element_type=jnp.float32)  # (Bt*T, V) : rhs[b, w, t]^T

    be = be_ref[...]
    acts = []
    for b in range(bt):  # small static unroll over the batch tile
        lhs_b = lhs[b * T:(b + 1) * T, :]                                # (T, V)
        rhs_b = rhsT[b * T:(b + 1) * T, :]                               # (T, V)
        # product[t1, t2] = sum_w lhs[t1, w] * rhs[w, t2]  (single dot per batch)
        prod_b = lax.dot_general(lhs_b, rhs_b, (((1,), (1,)), ((), ())),
                                 preferred_element_type=jnp.float32)     # (T, T)
        acts.append(jnp.maximum(prod_b + be, 0.0))
    act = acts[0] if bt == 1 else jnp.concatenate(acts, axis=1)          # (T, Bt*T)

    # E = V_e @ relu(product + b_e): one dot for the whole lane-packed slab.
    E = jnp.dot(ve_ref[...], act, preferred_element_type=jnp.float32)    # (T, Bt*T)

    # Softmax over torch dim=1 == rows of each per-batch (T, T) tile.  It is a
    # per-column operation, so it is valid on the lane-packed slab directly.
    E = E - jnp.max(E, axis=0, keepdims=True)
    ex = jnp.exp(E)
    denom = jnp.sum(ex, axis=0, keepdims=True)
    # Exact divide; pl.reciprocal(denom, approx=True) would move this to the
    # EUP slot but is slightly looser than the 1e-4 check below.
    en = ex / denom
    # Final F.relu of the module is a no-op on softmax output -> dropped.
    out_ref[0] = en.astype(out_ref.dtype)


def _pick_batch_tile(batch):
    # Largest divisor of `batch` that (a) keeps at least 2 grid steps when
    # batch >= 2 (so both v7x TensorCores / megacore halves get work) and
    # (b) caps the per-step footprint (fits easily in v7x's 64 MiB VMEM).
    cap = max(1, min(8, batch // 2 if batch >= 2 else 1))
    for bt in range(cap, 0, -1):
        if batch % bt == 0:
            return bt
    return 1


@functools.partial(jax.jit, static_argnames=("batch_tile",))
def temporal_attention(x, U1, U2, U3, b_e, V_e, *, batch_tile=None):
    """x: (B, V, C, T) float32 -> (B, T, T) float32."""
    B, V, C, T = x.shape
    bt = _pick_batch_tile(B) if batch_tile is None else batch_tile
    assert B % bt == 0, "batch_tile must divide the batch size"
    nsteps = B // bt

    # Single lane-dense view of x (rows = (b, t), cols = (c, v)).  Both weight
    # contractions consume this one copy; the second transposed copy of the
    # old version (xc) is gone - rhs is derived from xa inside the kernel.
    xa = jnp.transpose(x, (0, 3, 2, 1)).reshape(nsteps, bt * T, C * V)
    # Fused weights (tiny parameter prep): W1 = U1 (outer) U2; W3 folds U3
    # into a block identity so xa @ W3 == rhs^T per (b, t) row.
    W1 = (U1[None, :, None] * U2[:, None, :]).reshape(C * V, V)
    W3 = (U3[:, None, None] * jnp.eye(V, dtype=x.dtype)[None, :, :]).reshape(C * V, V)
    be2 = b_e[0]                                                       # (T, T)

    grid_spec = pltpu.PrefetchScalarGridSpec(
        num_scalar_prefetch=0,
        grid=(nsteps,),
        in_specs=[
            pl.BlockSpec((1, bt * T, C * V), lambda i: (i, 0, 0)),
            # Parameter blocks are grid-invariant (constant index_map); the
            # pipeline only fetches them once.  (pl.Buffered(1) would also
            # drop their second VMEM buffer - minor, skipped for safety.)
            pl.BlockSpec((C * V, V), lambda i: (0, 0)),
            pl.BlockSpec((C * V, V), lambda i: (0, 0)),
            pl.BlockSpec((T, T), lambda i: (0, 0)),
            pl.BlockSpec((T, T), lambda i: (0, 0)),
        ],
        out_specs=pl.BlockSpec((1, T, bt * T), lambda i: (i, 0, 0)),
    )

    packed = pl.pallas_call(
        temporal_attention_kernel,
        out_shape=jax.ShapeDtypeStruct((nsteps, T, bt * T), x.dtype),
        grid_spec=grid_spec,
        compiler_params=pltpu.CompilerParams(
            dimension_semantics=("parallel",)),
    )(xa, W1, W3, be2, V_e)

    # Un-pack the lane-packed output: packed[i, t1, b*T + t2] -> out[i*bt + b, t1, t2].
    return packed.reshape(nsteps, T, bt, T).transpose(0, 2, 1, 3).reshape(B, T, T)


def reference(x, U1, U2, U3, b_e, V_e):
    """Pure-JAX reference mirroring the PyTorch forward exactly."""
    lhs = jnp.einsum("bvct,v->btc", x, U1)
    lhs = jnp.einsum("btc,cw->btw", lhs, U2)
    rhs = jnp.einsum("bvct,c->bvt", x, U3)
    prod = jnp.einsum("btv,bvs->bts", lhs, rhs)
    E = jnp.einsum("ts,bsu->btu", V_e, jax.nn.relu(prod + b_e))
    E = E - jnp.max(E, axis=1, keepdims=True)
    ex = jnp.exp(E)
    En = ex / jnp.sum(ex, axis=1, keepdims=True)
    return jax.nn.relu(En)


if __name__ == "__main__":
    # Small shapes consistent with the module: batch=4, vertices=16,
    # features=4, timesteps=8.  batch=4 -> batch_tile=2, grid=(2,), which
    # exercises the batched/packed path while keeping >=2 parallel steps.
    B, V, C, T = 4, 16, 4, 8

    key = jax.random.PRNGKey(0)
    k1, k2, k3, k4, k5, kx = jax.random.split(key, 6)
    U1 = jax.random.normal(k1, (V,), jnp.float32)
    U2 = jax.random.normal(k2, (C, V), jnp.float32)
    U3 = jax.random.normal(k3, (C,), jnp.float32)
    b_e = jax.random.normal(k4, (1, T, T), jnp.float32)
    V_e = jax.random.normal(k5, (T, T), jnp.float32)
    x = jax.random.normal(kx, (B, V, C, T), jnp.float32)

    out = jax.block_until_ready(temporal_attention(x, U1, U2, U3, b_e, V_e))
    ref = jax.block_until_ready(reference(x, U1, U2, U3, b_e, V_e))

    if not jnp.allclose(out, ref, rtol=1e-4, atol=1e-4):
        raise AssertionError(
            f"Pallas kernel mismatch: max abs err = {jnp.max(jnp.abs(out - ref))}")

    print("KERNEL_OK")
</pallas_src>

<mosaic_0001>
module attributes {stable_mosaic.version = 11 : i64} {
  func.func @temporal_attention_kernel(%arg0: i32, %arg1: memref<1x16x64xf32, #tpu.memory_space<vmem>>, %arg2: memref<64x16xf32, #tpu.memory_space<vmem>>, %arg3: memref<64x16xf32, #tpu.memory_space<vmem>>, %arg4: memref<8x8xf32, #tpu.memory_space<vmem>>, %arg5: memref<8x8xf32, #tpu.memory_space<vmem>>, %arg6: memref<1x8x16xf32, #tpu.memory_space<vmem>>) attributes {dimension_semantics = [#tpu.dimension_semantics<parallel>], iteration_bounds = array<i64: 2>, scalar_prefetch = 0 : i64, scratch_operands = 0 : i64, tpu.core_type = #tpu.core_type<tc>, window_params = [{transform_indices = @transform_0, window_bounds = array<i64: 1, 16, 64>}, {pipeline_mode = #tpu.pipeline_mode<synchronous>, transform_indices = @transform_1, window_bounds = array<i64: 64, 16>}, {pipeline_mode = #tpu.pipeline_mode<synchronous>, transform_indices = @transform_2, window_bounds = array<i64: 64, 16>}, {pipeline_mode = #tpu.pipeline_mode<synchronous>, transform_indices = @transform_3, window_bounds = array<i64: 8, 8>}, {pipeline_mode = #tpu.pipeline_mode<synchronous>, transform_indices = @transform_4, window_bounds = array<i64: 8, 8>}, {transform_indices = @transform_5, window_bounds = array<i64: 1, 8, 16>}]} {
    %c0 = arith.constant 0 : index
    %c0_0 = arith.constant 0 : index
    %c0_1 = arith.constant 0 : index
    %0 = vector.load %arg1[%c0, %c0_0, %c0_1] : memref<1x16x64xf32, #tpu.memory_space<vmem>>, vector<1x16x64xf32>
    %1 = vector.shape_cast %0 : vector<1x16x64xf32> to vector<16x64xf32>
    %c0_2 = arith.constant 0 : index
    %c0_3 = arith.constant 0 : index
    %2 = vector.load %arg2[%c0_2, %c0_3] : memref<64x16xf32, #tpu.memory_space<vmem>>, vector<64x16xf32>
    %cst = arith.constant dense<0.000000e+00> : vector<16x16xf32>
    %3 = tpu.matmul %1, %2, %cst {dimension_numbers = #tpu.dot_dimension_numbers<[1], [0], [0], [1], [0, 0, 1, 1], [], []>} : vector<16x64xf32>, vector<64x16xf32>, vector<16x16xf32> -> vector<16x16xf32>
    %c0_4 = arith.constant 0 : index
    %c0_5 = arith.constant 0 : index
    %4 = vector.load %arg3[%c0_4, %c0_5] : memref<64x16xf32, #tpu.memory_space<vmem>>, vector<64x16xf32>
    %cst_6 = arith.constant dense<0.000000e+00> : vector<16x16xf32>
    %5 = tpu.matmul %1, %4, %cst_6 {dimension_numbers = #tpu.dot_dimension_numbers<[1], [0], [0], [1], [0, 0, 1, 1], [], []>} : vector<16x64xf32>, vector<64x16xf32>, vector<16x16xf32> -> vector<16x16xf32>
    %c0_7 = arith.constant 0 : index
    %c0_8 = arith.constant 0 : index
    %6 = vector.load %arg4[%c0_7, %c0_8] : memref<8x8xf32, #tpu.memory_space<vmem>>, vector<8x8xf32>
    %7 = vector.extract_strided_slice %3 {offsets = [0, 0], sizes = [8, 16], strides = [1, 1]} : vector<16x16xf32> to vector<8x16xf32>
    %8 = vector.extract_strided_slice %5 {offsets = [0, 0], sizes = [8, 16], strides = [1, 1]} : vector<16x16xf32> to vector<8x16xf32>
    %cst_9 = arith.constant dense<0.000000e+00> : vector<8x8xf32>
    %9 = tpu.matmul %7, %8, %cst_9 {dimension_numbers = #tpu.dot_dimension_numbers<[1], [1], [0], [0], [0, 0, 1, 0], [], []>} : vector<8x16xf32>, vector<8x16xf32>, vector<8x8xf32> -> vector<8x8xf32>
    %10 = arith.addf %9, %6 : vector<8x8xf32>
    %cst_10 = arith.constant 0.000000e+00 : f32
    %11 = vector.broadcast %cst_10 : f32 to vector<8x8xf32>
    %12 = arith.maximumf %10, %11 : vector<8x8xf32>
    %13 = vector.extract_strided_slice %3 {offsets = [8, 0], sizes = [8, 16], strides = [1, 1]} : vector<16x16xf32> to vector<8x16xf32>
    %14 = vector.extract_strided_slice %5 {offsets = [8, 0], sizes = [8, 16], strides = [1, 1]} : vector<16x16xf32> to vector<8x16xf32>
    %cst_11 = arith.constant dense<0.000000e+00> : vector<8x8xf32>
    %15 = tpu.matmul %13, %14, %cst_11 {dimension_numbers = #tpu.dot_dimension_numbers<[1], [1], [0], [0], [0, 0, 1, 0], [], []>} : vector<8x16xf32>, vector<8x16xf32>, vector<8x8xf32> -> vector<8x8xf32>
    %16 = arith.addf %15, %6 : vector<8x8xf32>
    %cst_12 = arith.constant 0.000000e+00 : f32
    %17 = vector.broadcast %cst_12 : f32 to vector<8x8xf32>
    %18 = arith.maximumf %16, %17 : vector<8x8xf32>
    %19 = tpu.concatenate %12, %18 in 1 : vector<8x8xf32>, vector<8x8xf32> -> vector<8x16xf32>
    %c0_13 = arith.constant 0 : index
    %c0_14 = arith.constant 0 : index
    %20 = vector.load %arg5[%c0_13, %c0_14] : memref<8x8xf32, #tpu.memory_space<vmem>>, vector<8x8xf32>
    %cst_15 = arith.constant dense<0.000000e+00> : vector<8x16xf32>
    %21 = tpu.matmul %20, %19, %cst_15 {dimension_numbers = #tpu.dot_dimension_numbers<[1], [0], [0], [1], [0, 0, 1, 1], [], []>} : vector<8x8xf32>, vector<8x16xf32>, vector<8x16xf32> -> vector<8x16xf32>
    %cst_16 = arith.constant dense<0xFF800000> : vector<16xf32>
    %22 = vector.multi_reduction <maximumf>, %21, %cst_16 [0] : vector<8x16xf32> to vector<16xf32>
    %23 = vector.shape_cast %22 : vector<16xf32> to vector<1x16xf32>
    %24 = vector.broadcast %23 : vector<1x16xf32> to vector<8x16xf32>
    %25 = arith.subf %21, %24 : vector<8x16xf32>
    %26 = math.exp %25 : vector<8x16xf32>
    %cst_17 = arith.constant dense<0.000000e+00> : vector<16xf32>
    %27 = vector.multi_reduction <add>, %26, %cst_17 [0] : vector<8x16xf32> to vector<16xf32>
    %28 = vector.shape_cast %27 : vector<16xf32> to vector<1x16xf32>
    %29 = vector.broadcast %28 : vector<1x16xf32> to vector<8x16xf32>
    %30 = arith.divf %26, %29 : vector<8x16xf32>
    %c0_18 = arith.constant 0 : index
    %c0_19 = arith.constant 0 : index
    %c0_20 = arith.constant 0 : index
    %31 = vector.load %arg6[%c0_18, %c0_19, %c0_20] : memref<1x8x16xf32, #tpu.memory_space<vmem>>, vector<1x8x16xf32>
    %32 = vector.shape_cast %31 : vector<1x8x16xf32> to vector<8x16xf32>
    %33 = vector.shape_cast %30 : vector<8x16xf32> to vector<1x8x16xf32>
    tpu.vector_store %arg6[%c0_18, %c0_19, %c0_20], %33 {strides = array<i32>} : memref<1x8x16xf32, #tpu.memory_space<vmem>>, vector<1x8x16xf32>,
    return
  }
  func.func @transform_0(%arg0: i32) -> (i32, i32, i32) {
    %c0_i32 = arith.constant 0 : i32
    %c0_i32_0 = arith.constant 0 : i32
    %c0_i32_1 = arith.constant 0 : i32
    return %arg0, %c0_i32, %c0_i32_0 : i32, i32, i32
  }
  func.func @transform_1(%arg0: i32) -> (i32, i32) {
    %c0_i32 = arith.constant 0 : i32
    %c0_i32_0 = arith.constant 0 : i32
    %c0_i32_1 = arith.constant 0 : i32
    return %c0_i32, %c0_i32_0 : i32, i32
  }
  func.func @transform_2(%arg0: i32) -> (i32, i32) {
    %c0_i32 = arith.constant 0 : i32
    %c0_i32_0 = arith.constant 0 : i32
    %c0_i32_1 = arith.constant 0 : i32
    return %c0_i32, %c0_i32_0 : i32, i32
  }
  func.func @transform_3(%arg0: i32) -> (i32, i32) {
    %c0_i32 = arith.constant 0 : i32
    %c0_i32_0 = arith.constant 0 : i32
    %c0_i32_1 = arith.constant 0 : i32
    return %c0_i32, %c0_i32_0 : i32, i32
  }
  func.func @transform_4(%arg0: i32) -> (i32, i32) {
    %c0_i32 = arith.constant 0 : i32
    %c0_i32_0 = arith.constant 0 : i32
    %c0_i32_1 = arith.constant 0 : i32
    return %c0_i32, %c0_i32_0 : i32, i32
  }
  func.func @transform_5(%arg0: i32) -> (i32, i32, i32) {
    %c0_i32 = arith.constant 0 : i32
    %c0_i32_0 = arith.constant 0 : i32
    %c0_i32_1 = arith.constant 0 : i32
    return %arg0, %c0_i32, %c0_i32_0 : i32, i32, i32
  }
}

</mosaic_0001>

<bundles_post_ra>
// kernel: temporal_attention.1
= control target key start
LH: loop header
LB: loop body
LE: loop exit
PB: predicated region body
PF: predicated region fallthrough
CT: control target
= control target key end

     0   :  { %s894_s18 = smov 0   ;;  %s980_s0 = inlined_call_operand.vmem [shape: f32[2,16,64], index: 0, kind: input, shape index: {}]   ;;  %s981_s1 = inlined_call_operand.vmem [shape: f32[64,16], index: 1, kind: input, shape index: {}]   ;;  %s982_s2 = inlined_call_operand.vmem [shape: f32[64,16], index: 2, kind: input, shape index: {}]   ;;  %s983_s3 = inlined_call_operand.vmem [shape: f32[8,8], index: 3, kind: input, shape index: {}]   ;;  %s984_s4 = inlined_call_operand.vmem [shape: f32[8,8], index: 4, kind: input, shape index: {}]   ;;  %s985_s5 = inlined_call_operand.vmem [shape: f32[2,8,16], index: 5, kind: output, shape index: {}]  }
   0x1 LB: > { %s707_s19 = sadd.s32 4294967295, %s859_s18   ;;  %p711_p0 = scmp.ge.s32.totalorder %s859_s18, 1  ;;  %s859_s18 = sphi %s894_s18, %s15_s18  }
   0x2   : > { %p187_p1 = scmp.lt.s32.totalorder %s859_s18, 3 }
   0x4   : > { %p188_p2 = pnand %p711_p0, %p187_p1 }
   0x5   : > { %v315_v0 = vld [vmem:[%s982_s2] sm:$0xff] (!%p188_p2)  ;;  %v316_v1 = vld [vmem:[%s982_s2 + $0x8] sm:$0xff] (!%p188_p2)  ;;  %p214_p3 = scmp.lt.s32.totalorder (!%p188_p2), %s707_s19, 1  ;;  %v317_v5 = vld [vmem:[%s982_s2 + $0x10] sm:$0xff] (!%p188_p2)  ;;  %vm233_vm0 = vcmask (!%p188_p2), 523264   ;;  %v861_v26 = vmov (!%p188_p2), 0.0  }
   0x6   : > { %191 = sbr.rel (%p188_p2) target bundleno = 840 (0x348), region = 40  ;;  %v225_v2 = vld [vmem:[%s981_s1] sm:$0xff] (!%p188_p2)  ;;  %v822_v3 = vpack.c.bf16 (!%p188_p2), %v316_v1, %v315_v0  ;;  %v226_v4 = vld [vmem:[%s981_s1 + $0x8] sm:$0xff] (!%p188_p2)  ;;  %v318_v6 = vld [vmem:[%s982_s2 + $0x18] sm:$0xff] (!%p188_p2)  ;;  %vm862_vm1 = vmmov (!%p188_p2), 0   ;;  %vm399_vm2 = vcmask (!%p188_p2), 130048  }
   0x7   : > { %v806_v7 = vpack.c.bf16 (!%p188_p2), %v226_v4, %v225_v2  ;;  %v826_v8 = vpack.c.bf16 (!%p188_p2), %v318_v6, %v317_v5  ;;  %v227_v9 = vld [vmem:[%s981_s1 + $0x10] sm:$0xff] (!%p188_p2)  ;;  %v228_v10 = vld [vmem:[%s981_s1 + $0x18] sm:$0xff] (!%p188_p2)  ;;  %v319_v11 = vld [vmem:[%s982_s2 + $0x20] sm:$0xff] (!%p188_p2)  ;;  %s863_s10 = smov (!%p188_p2), 8   ;;  %vm558_vm3 = vcmask (!%p188_p2), 64512  }
   0x8   : > { %823 = vmatprep.subr.bf16.mxu1 (!%p188_p2), %v822_v3  ;;  %v810_v12 = vpack.c.bf16 (!%p188_p2), %v228_v10, %v227_v9  ;;  %v320_v13 = vld [vmem:[%s982_s2 + $0x28] sm:$0xff] (!%p188_p2)  ;;  %v229_v14 = vld [vmem:[%s981_s1 + $0x20] sm:$0xff] (!%p188_p2)  ;;  %v321_v18 = vld [vmem:[%s982_s2 + $0x30] sm:$0xff] (!%p188_p2) }
   0x9   : > { %v230_v15 = vld [vmem:[%s981_s1 + $0x28] sm:$0xff] (!%p188_p2)  ;;  %825 = vmatpush3.bf16.msra.mxu1 (!%p188_p2), %v822_v3  ;;  %807 = vmatprep.subr.bf16.mxu0 (!%p188_p2), %v806_v7  ;;  %v830_v16 = vpack.c.bf16 (!%p188_p2), %v320_v13, %v319_v11  ;;  %v322_v19 = vld [vmem:[%s982_s2 + $0x38] sm:$0xff] (!%p188_p2)  ;;  %v231_v21 = vld [vmem:[%s981_s1 + $0x30] sm:$0xff] (!%p188_p2) }
   0xa   : > { %809 = vmatpush3.bf16.msra.mxu0 (!%p188_p2), %v806_v7  ;;  %827 = vmatprep.subr.bf16.mxu1 (!%p188_p2), %v826_v8  ;;  %v814_v17 = vpack.c.bf16 (!%p188_p2), %v230_v15, %v229_v14  ;;  %v232_v22 = vld [vmem:[%s981_s1 + $0x38] sm:$0xff] (!%p188_p2)  ;;  %v834_v23 = vpack.c.bf16 (!%p188_p2), %v322_v19, %v321_v18  ;;  %v398_v31 = vld [vmem:[%s983_s3] sm:$0xff] (!%p188_p2) }
   0xb   : > { %811 = vmatprep.subr.bf16.mxu0 (!%p188_p2), %v810_v12  ;;  %v818_v24 = vpack.c.bf16 (!%p188_p2), %v232_v22, %v231_v21  ;;  %v560_v41 = vld [vmem:[%s984_s4] sm:$0xff] (!%p188_p2) }
   0xd   : > { %s987_s19 = smov (!%p214_p3, %s707_s19), 1  ;;  %829 = vmatpush3.bf16.msra.mxu1 %v826_v8 }
   0xe   : > { %s726_s21 = sshll.u32 %s987_s19, 4  ;;  %813 = vmatpush3.bf16.msra.mxu0 %v810_v12  ;;  %831 = vmatprep.subr.bf16.mxu1 %v830_v16  ;;  %s714_s13 = sshll.u32 %s987_s19, 3 }
   0xf   : > { %s218_s24 = scalar_lea.vmem %s980_s0, %s726_s21  ;;  %815 = vmatprep.subr.bf16.mxu0 %v814_v17  ;;  %s222_s16 = scalar_lea.vmem %s985_s5, %s714_s13 }
  0x10   : > { %v223_v20 = vld [vmem:[%s218_s24] sm:$0xff]  ;;  %v224_v25 = vld [vmem:[%s218_s24 + $0x8] sm:$0xff] }
  0x11   : > { %788 = vmatprep.mubr.msk.f32.mxu1 %vm233_vm0, %v223_v20  ;;  %769 = vmatprep.mubr.msk.f32.mxu0 %vm233_vm0, %v223_v20 }
  0x12   : > { %833 = vmatpush3.bf16.msra.mxu1 %v830_v16  ;;  %817 = vmatpush3.bf16.msra.mxu0 %v814_v17 }
  0x13   : > { %835 = vmatprep.subr.bf16.mxu1 %v834_v23  ;;  %819 = vmatprep.subr.bf16.mxu0 %v818_v24 }
  0x16   : > { %837 = vmatpush3.bf16.msra.mxu1 %v834_v23  ;;  %821 = vmatpush3.bf16.msra.mxu0 %v818_v24 }
  0x17   : > { %796 = vmatprep.subr.mxu1 %v861_v26  ;;  %791 = vmatprep.subr.mxu0 %v861_v26 }
  0x19   : > { %789 = vmatmul.mubr.msk.f32.vlgmr.msra.gmra.mrb[0].mxu1 %vm233_vm0, %v224_v25  ;;  %770 = vmatmul.mubr.msk.f32.vlgmr.msra.gmra.mrb[0].mxu0 %vm233_vm0, %v224_v25 }
  0x1a   : > { %798 = vmatprep.mubr.msk.f32.mxu1 %vm862_vm1, %v861_v26  ;;  %793 = vmatprep.mubr.msk.f32.mxu0 %vm862_vm1, %v861_v26 }
  0xec   : > { %v790_v27 = vpop.f32.mrb[0].mxu1  ;;  %v771_v29 = vpop.f32.mrb[0].mxu0 }
  0xed   : > { %v389_v28 = vpop.f32.mrb[1].mxu1  ;;  %797 = vmatpush3.xpose.msk.msra.mxu1 %vm399_vm2, %v790_v27  ;;  %v306_v30 = vpop.f32.mrb[1].mxu0 }
  0xee   : > { %792 = vmatpush3.xpose.msk.msra.mxu0 %vm399_vm2, %v389_v28 }
  0xef   : > { %801 = vmatprep.subr.mxu0 %v861_v26 }
  0xf0   : > { %799 = vmatmul.mubr.msk.f32.vlgmr.msra.gmra.mrb[2].mxu1 %vm399_vm2, %v771_v29 }
  0xf1   : > { %794 = vmatmul.mubr.msk.f32.vlgmr.msra.gmra.mrb[2].mxu0 %vm399_vm2, %v306_v30 }
  0xf2   : > { %803 = vmatprep.mubr.msk.f32.mxu0 %vm862_vm1, %v861_v26 }
 0x1c3   : > { %v549_v32 = vpop.f32.mrb[2].mxu1 }
 0x1c4   : > { %v550_v33 = vadd.f32 %v549_v32, %v398_v31  ;;  %v472_v34 = vpop.f32.mrb[2].mxu0  ;;  %v800_v35 = vpop.f32.mrb[3].mxu1 }
 0x1c5   : > { %v473_v36 = vadd.f32 %v472_v34, %v398_v31  ;;  %v795_v37 = vpop.f32.mrb[3].mxu0 }
 0x1c6   : > { %v553_v38 = vmax.f32 %v550_v33, 0.0 }
 0x1c7   : > { %v476_v39 = vmax.f32 %v473_v36, 0.0 }
 0x1c8   : > { %555 = vrot.lane.b32.xlu0 %v553_v38, %s863_s10 }
 0x23a   : > { %v556_v40 = vpop.permute.xlu0 %555 }
 0x23b   : > { %v559_v42 = vsel %vm558_vm3, %v476_v39, %v556_v40 }
 0x23c   : > { %802 = vmatpush3.msra.mxu0 %v559_v42 }
 0x23d   : > { %804 = vmatmul.mubr.msk.f32.vlgmr.msra.gmra.mrb[4].mxu0 %vm558_vm3, %v560_v41 }
 0x310   : > { %v630_v43 = vpop.f32.mrb[4].mxu0 }
 0x311   : > { %v634_v44 = vsel %vm399_vm2, %v630_v43, -inf  ;;  %v805_v45 = vpop.f32.mrb[5].mxu0 }
 0x312   : > { %v635_v46 = vrot.slane %v634_v44, 4 }
 0x314   : > { %v636_v47 = vmax.f32 %v634_v44, %v635_v46 }
 0x316   : > { %v637_v48 = vrot.slane %v636_v47, 2 }
 0x318   : > { %v638_v49 = vmax.f32 %v636_v47, %v637_v48 }
 0x31a   : > { %v639_v50 = vrot.slane %v638_v49, 1 }
 0x31c   : > { %v640_v51 = vmax.f32 %v638_v49, %v639_v50 }
 0x31e   : > { %v641_v52 = vsub.f32 %v630_v43, %v640_v51 }
 0x320   : > { %v642_v53 = vmul.f32 1.442695, %v641_v52 }
 0x322   : > { %849 = vpow2.f32 %v642_v53 }
 0x32c   : > { %v850_v54 = vpop.eup %849 }
 0x32d   : > { %v644_v55 = vsel %vm399_vm2, %v850_v54, 0.0 }
 0x32e   : > { %v645_v56 = vrot.slane %v644_v55, 4 }
 0x330   : > { %v646_v57 = vadd.f32 %v645_v56, %v644_v55 }
 0x332   : > { %v647_v58 = vrot.slane %v646_v57, 2 }
 0x334   : > { %v648_v59 = vadd.f32 %v647_v58, %v646_v57 }
 0x336   : > { %v649_v60 = vrot.slane %v648_v59, 1 }
 0x338   : > { %v650_v61 = vadd.f32 %v649_v60, %v648_v59 }
 0x33a   : > { %851 = vrcp.f32 %v650_v61 }
 0x344   : > { %v852_v62 = vpop.eup %851 }
 0x345   : > { %v652_v63 = vmul.f32 %v852_v62, %v850_v54 }
 0x347   : > { %653 = vst.msk [vmem:[%s222_s16] sm:$0xff] %vm399_vm2, %v652_v63 }
 0x348 PF: > { %s15_s18 = sadd.s32 1, %s859_s18  }
 0x349   : > { %p12_p4 = scmp.ge.s32.totalorder %s15_s18, 4  }
 0x34b   :  { %14 = sbr.rel (!%p12_p4) target bundleno = 1 (0x1), region = 70 }

</bundles_post_ra>
